<compile_context>
chip_gen: v7x
topology: tpu7x:2x2x1
jax: 0.10.0
libtpu: 0.0.40
codegen_flags: <defaults>
</compile_context>

<pallas_src>
import jax
import jax.numpy as jnp
from jax.experimental import pallas as pl
from jax.experimental.pallas import tpu as pltpu

HIDDEN = 64    # logical hidden width (matches the PyTorch module)
LANE = 128     # TPU lane width: hidden dim padded to this
MAX_TB = 1024  # cap on batch-tile rows (well within VMEM on v5e/v6e/v7x)


def critic_net_kernel(x_ref, w1_ref, b1_ref, w2_ref, b2_ref, w3_ref, b3_ref, out_ref):
    # Cast the f32 input tile to bf16 in-VMEM (no extra HBM pass in the wrapper).
    x = x_ref[...].astype(jnp.bfloat16)
    # Layer 1: Linear + ReLU (bf16 operands, f32 accumulate, f32 bias add)
    h1 = jnp.dot(x, w1_ref[...], preferred_element_type=jnp.float32)
    h1 = jnp.maximum(h1 + b1_ref[...], 0.0)
    # Layer 2: Linear + ReLU
    h2 = jnp.dot(h1.astype(jnp.bfloat16), w2_ref[...], preferred_element_type=jnp.float32)
    h2 = jnp.maximum(h2 + b2_ref[...], 0.0)
    # Layer 3 (value head), kept in f32 for precision. Produce a lane-dense
    # (1, tb) value row: w3_row (1, 128) @ h2^T (128, tb). The transpose rides
    # the XLU slot; the padded hidden lanes of h2 and w3_row are exact zeros.
    v = jnp.dot(w3_ref[...], h2.T, preferred_element_type=jnp.float32)
    out_ref[...] = v + b3_ref[...]


def init_params(key, state_dim, hidden=HIDDEN):
    """PyTorch nn.Linear-style uniform(-1/sqrt(fan_in), +1/sqrt(fan_in)) init.
    Weights stored pre-transposed: (in_features, out_features)."""
    keys = jax.random.split(key, 6)

    def linear(kw, kb, fan_in, fan_out):
        bound = 1.0 / jnp.sqrt(jnp.float32(fan_in))
        w = jax.random.uniform(kw, (fan_in, fan_out), jnp.float32, -bound, bound)
        b = jax.random.uniform(kb, (fan_out,), jnp.float32, -bound, bound)
        return w, b

    w1, b1 = linear(keys[0], keys[1], state_dim, hidden)
    w2, b2 = linear(keys[2], keys[3], hidden, hidden)
    w3, b3 = linear(keys[4], keys[5], hidden, 1)
    return {"w1": w1, "b1": b1, "w2": w2, "b2": b2, "w3": w3, "b3": b3}


def prepare_params(params):
    """Zero-pad hidden dims to 128 lanes; bf16 for layers 1-2, f32 value head.

    Padded weight columns / bias lanes are exactly zero, so padded hidden
    lanes are ReLU(0 + 0) = 0 and multiply against the zero lanes of the
    (1, 128) value-head row -> provably inert.
    """
    def pad_to(a, shape):
        out = jnp.zeros(shape, a.dtype)
        return out.at[tuple(slice(0, s) for s in a.shape)].set(a)

    S = params["w1"].shape[0]
    w1 = pad_to(params["w1"], (S, LANE)).astype(jnp.bfloat16)
    w2 = pad_to(params["w2"], (LANE, LANE)).astype(jnp.bfloat16)
    # Value head stored as a lane-dense f32 row: w3^T padded to (1, 128).
    w3 = pad_to(params["w3"].T, (1, LANE))                 # f32
    b1 = pad_to(params["b1"].reshape(1, -1), (1, LANE))    # f32
    b2 = pad_to(params["b2"].reshape(1, -1), (1, LANE))    # f32
    b3 = params["b3"].reshape(1, 1)                        # f32 scalar
    return {"w1": w1, "b1": b1, "w2": w2, "b2": b2, "w3": w3, "b3": b3}


def _round_up(n, m):
    return ((n + m - 1) // m) * m


def _pick_tile(batch):
    """Batch-tile selection.

    Small batches: a single round_up(B, 16) tile (no wasted padding rows).
    Large batches: 128-aligned tiles capped at MAX_TB, sized so the grid has
    >= 2 steps (so the "parallel" batch axis shards across both v7x TCs).
    """
    if batch <= 512:
        return _round_up(batch, 16)
    half = (batch + 1) // 2
    return min(MAX_TB, _round_up(half, 128))


def critic_net_forward(x, padded_params, *, tb=None):
    """x: (B, state_dim) float32. Returns (B, 1) float32 state values."""
    w1, b1 = padded_params["w1"], padded_params["b1"]
    w2, b2 = padded_params["w2"], padded_params["b2"]
    w3, b3 = padded_params["w3"], padded_params["b3"]

    B, S = x.shape
    if tb is None:
        tb = _pick_tile(B)
    n_tiles = -(-B // tb)
    b_pad = n_tiles * tb

    # Batch padding only when needed (f32, no cast -> no extra x round-trip
    # when B already divides the tile).
    if b_pad != B:
        x = jnp.pad(x, ((0, b_pad - B), (0, 0)))

    flops = 2 * b_pad * (S * LANE + LANE * LANE + LANE)
    bytes_accessed = (
        b_pad * S * 4                       # x read (f32, straight from HBM)
        + (w1.size + w2.size) * 2           # bf16 weights (resident)
        + (b1.size + b2.size + w3.size + b3.size) * 4
        + b_pad * 4                         # lane-dense f32 value row out
    )

    # Weights/biases: full-array blocks with constant index_map -> resident in VMEM.
    resident = lambda arr: pl.BlockSpec(arr.shape, lambda i: (0, 0))

    out = pl.pallas_call(
        critic_net_kernel,
        out_shape=jax.ShapeDtypeStruct((1, b_pad), jnp.float32),
        grid_spec=pl.GridSpec(
            grid=(n_tiles,),
            in_specs=[
                pl.BlockSpec((tb, S), lambda i: (i, 0)),   # x: blocked over batch
                resident(w1), resident(b1),
                resident(w2), resident(b2),
                resident(w3), resident(b3),
            ],
            out_specs=pl.BlockSpec((1, tb), lambda i: (0, i)),
        ),
        compiler_params=pltpu.CompilerParams(
            dimension_semantics=("parallel",),
        ),
        cost_estimate=pl.CostEstimate(
            flops=flops, transcendentals=0, bytes_accessed=bytes_accessed),
    )(x, w1, b1, w2, b2, w3, b3)

    # Drop batch padding; return (B, 1) state values.
    return out[0, :B].reshape(B, 1)


def reference_forward(x, params):
    h1 = jnp.maximum(x @ params["w1"] + params["b1"], 0.0)
    h2 = jnp.maximum(h1 @ params["w2"] + params["b2"], 0.0)
    return h2 @ params["w3"] + params["b3"]


if __name__ == "__main__":
    key = jax.random.PRNGKey(0)
    k_param, k_x = jax.random.split(key)

    batch = 8          # small demo batch; tile becomes round_up(8, 16) = 16 rows
    state_dim = 32

    params = init_params(k_param, state_dim)
    padded_params = prepare_params(params)   # one-time pad + bf16 cast (layers 1-2)
    x = jax.random.normal(k_x, (batch, state_dim), jnp.float32)

    state_value = critic_net_forward(x, padded_params)
    jax.block_until_ready(state_value)

    ref = reference_forward(x, params)       # f32 reference (PyTorch semantics)
    assert state_value.shape == (batch, 1), state_value.shape
    max_err = float(jnp.max(jnp.abs(state_value - ref)))
    # bf16 operands in layers 1-2 (f32 accumulation, f32 value head): loosened tol.
    assert jnp.allclose(state_value, ref, atol=3e-2, rtol=3e-2), max_err

    print("KERNEL_OK")
</pallas_src>

<mosaic_0001>
module attributes {stable_mosaic.version = 11 : i64} {
  func.func @critic_net_kernel(%arg0: i32, %arg1: memref<16x32xf32, #tpu.memory_space<vmem>>, %arg2: memref<32x128xbf16, #tpu.memory_space<vmem>>, %arg3: memref<1x128xf32, #tpu.memory_space<vmem>>, %arg4: memref<128x128xbf16, #tpu.memory_space<vmem>>, %arg5: memref<1x128xf32, #tpu.memory_space<vmem>>, %arg6: memref<1x128xf32, #tpu.memory_space<vmem>>, %arg7: memref<1x1xf32, #tpu.memory_space<vmem>>, %arg8: memref<1x16xf32, #tpu.memory_space<vmem>>) attributes {dimension_semantics = [#tpu.dimension_semantics<parallel>], iteration_bounds = array<i64: 1>, scalar_prefetch = 0 : i64, scratch_operands = 0 : i64, tpu.core_type = #tpu.core_type<tc>, window_params = [{transform_indices = @transform_0, window_bounds = array<i64: 16, 32>}, {pipeline_mode = #tpu.pipeline_mode<synchronous>, transform_indices = @transform_1, window_bounds = array<i64: 32, 128>}, {pipeline_mode = #tpu.pipeline_mode<synchronous>, transform_indices = @transform_2, window_bounds = array<i64: 1, 128>}, {pipeline_mode = #tpu.pipeline_mode<synchronous>, transform_indices = @transform_3, window_bounds = array<i64: 128, 128>}, {pipeline_mode = #tpu.pipeline_mode<synchronous>, transform_indices = @transform_4, window_bounds = array<i64: 1, 128>}, {pipeline_mode = #tpu.pipeline_mode<synchronous>, transform_indices = @transform_5, window_bounds = array<i64: 1, 128>}, {pipeline_mode = #tpu.pipeline_mode<synchronous>, transform_indices = @transform_6, window_bounds = array<i64: 1, 1>}, {transform_indices = @transform_7, window_bounds = array<i64: 1, 16>}]} {
    %c0 = arith.constant 0 : index
    %c0_0 = arith.constant 0 : index
    %0 = vector.load %arg1[%c0, %c0_0] : memref<16x32xf32, #tpu.memory_space<vmem>>, vector<16x32xf32>
    %1 = arith.truncf %0 : vector<16x32xf32> to vector<16x32xbf16>
    %c0_1 = arith.constant 0 : index
    %c0_2 = arith.constant 0 : index
    %2 = vector.load %arg2[%c0_1, %c0_2] : memref<32x128xbf16, #tpu.memory_space<vmem>>, vector<32x128xbf16>
    %cst = arith.constant dense<0.000000e+00> : vector<16x128xf32>
    %3 = tpu.matmul %1, %2, %cst {dimension_numbers = #tpu.dot_dimension_numbers<[1], [0], [0], [1], [0, 0, 1, 1], [], []>} : vector<16x32xbf16>, vector<32x128xbf16>, vector<16x128xf32> -> vector<16x128xf32>
    %c0_3 = arith.constant 0 : index
    %c0_4 = arith.constant 0 : index
    %4 = vector.load %arg3[%c0_3, %c0_4] : memref<1x128xf32, #tpu.memory_space<vmem>>, vector<1x128xf32>
    %5 = vector.broadcast %4 : vector<1x128xf32> to vector<16x128xf32>
    %6 = arith.addf %3, %5 : vector<16x128xf32>
    %cst_5 = arith.constant 0.000000e+00 : f32
    %7 = vector.broadcast %cst_5 : f32 to vector<16x128xf32>
    %8 = arith.maximumf %6, %7 : vector<16x128xf32>
    %9 = arith.truncf %8 : vector<16x128xf32> to vector<16x128xbf16>
    %c0_6 = arith.constant 0 : index
    %c0_7 = arith.constant 0 : index
    %10 = vector.load %arg4[%c0_6, %c0_7] : memref<128x128xbf16, #tpu.memory_space<vmem>>, vector<128x128xbf16>
    %cst_8 = arith.constant dense<0.000000e+00> : vector<16x128xf32>
    %11 = tpu.matmul %9, %10, %cst_8 {dimension_numbers = #tpu.dot_dimension_numbers<[1], [0], [0], [1], [0, 0, 1, 1], [], []>} : vector<16x128xbf16>, vector<128x128xbf16>, vector<16x128xf32> -> vector<16x128xf32>
    %c0_9 = arith.constant 0 : index
    %c0_10 = arith.constant 0 : index
    %12 = vector.load %arg5[%c0_9, %c0_10] : memref<1x128xf32, #tpu.memory_space<vmem>>, vector<1x128xf32>
    %13 = vector.broadcast %12 : vector<1x128xf32> to vector<16x128xf32>
    %14 = arith.addf %11, %13 : vector<16x128xf32>
    %cst_11 = arith.constant 0.000000e+00 : f32
    %15 = vector.broadcast %cst_11 : f32 to vector<16x128xf32>
    %16 = arith.maximumf %14, %15 : vector<16x128xf32>
    %c0_12 = arith.constant 0 : index
    %c0_13 = arith.constant 0 : index
    %17 = vector.load %arg6[%c0_12, %c0_13] : memref<1x128xf32, #tpu.memory_space<vmem>>, vector<1x128xf32>
    %18 = tpu.transpose %16, [1, 0] : vector<16x128xf32> -> vector<128x16xf32>
    %cst_14 = arith.constant dense<0.000000e+00> : vector<1x16xf32>
    %19 = tpu.matmul %17, %18, %cst_14 {dimension_numbers = #tpu.dot_dimension_numbers<[1], [0], [0], [1], [0, 0, 1, 1], [], []>} : vector<1x128xf32>, vector<128x16xf32>, vector<1x16xf32> -> vector<1x16xf32>
    %c0_15 = arith.constant 0 : index
    %c0_16 = arith.constant 0 : index
    %20 = vector.load %arg7[%c0_15, %c0_16] : memref<1x1xf32, #tpu.memory_space<vmem>>, vector<1x1xf32>
    %21 = vector.broadcast %20 : vector<1x1xf32> to vector<1x16xf32>
    %22 = arith.addf %19, %21 : vector<1x16xf32>
    %c0_17 = arith.constant 0 : index
    %c0_18 = arith.constant 0 : index
    %23 = vector.load %arg8[%c0_17, %c0_18] : memref<1x16xf32, #tpu.memory_space<vmem>>, vector<1x16xf32>
    tpu.vector_store %arg8[%c0_17, %c0_18], %22 {strides = array<i32>} : memref<1x16xf32, #tpu.memory_space<vmem>>, vector<1x16xf32>,
    return
  }
  func.func @transform_0(%arg0: i32) -> (i32, i32) {
    %c0_i32 = arith.constant 0 : i32
    %c0_i32_0 = arith.constant 0 : i32
    return %arg0, %c0_i32 : i32, i32
  }
  func.func @transform_1(%arg0: i32) -> (i32, i32) {
    %c0_i32 = arith.constant 0 : i32
    %c0_i32_0 = arith.constant 0 : i32
    %c0_i32_1 = arith.constant 0 : i32
    return %c0_i32, %c0_i32_0 : i32, i32
  }
  func.func @transform_2(%arg0: i32) -> (i32, i32) {
    %c0_i32 = arith.constant 0 : i32
    %c0_i32_0 = arith.constant 0 : i32
    %c0_i32_1 = arith.constant 0 : i32
    return %c0_i32, %c0_i32_0 : i32, i32
  }
  func.func @transform_3(%arg0: i32) -> (i32, i32) {
    %c0_i32 = arith.constant 0 : i32
    %c0_i32_0 = arith.constant 0 : i32
    %c0_i32_1 = arith.constant 0 : i32
    return %c0_i32, %c0_i32_0 : i32, i32
  }
  func.func @transform_4(%arg0: i32) -> (i32, i32) {
    %c0_i32 = arith.constant 0 : i32
    %c0_i32_0 = arith.constant 0 : i32
    %c0_i32_1 = arith.constant 0 : i32
    return %c0_i32, %c0_i32_0 : i32, i32
  }
  func.func @transform_5(%arg0: i32) -> (i32, i32) {
    %c0_i32 = arith.constant 0 : i32
    %c0_i32_0 = arith.constant 0 : i32
    %c0_i32_1 = arith.constant 0 : i32
    return %c0_i32, %c0_i32_0 : i32, i32
  }
  func.func @transform_6(%arg0: i32) -> (i32, i32) {
    %c0_i32 = arith.constant 0 : i32
    %c0_i32_0 = arith.constant 0 : i32
    %c0_i32_1 = arith.constant 0 : i32
    return %c0_i32, %c0_i32_0 : i32, i32
  }
  func.func @transform_7(%arg0: i32) -> (i32, i32) {
    %c0_i32 = arith.constant 0 : i32
    %c0_i32_0 = arith.constant 0 : i32
    return %c0_i32, %arg0 : i32, i32
  }
}

</mosaic_0001>

<bundles_post_ra>
// kernel: tpu_custom_call.1
= control target key start
LH: loop header
LB: loop body
LE: loop exit
PB: predicated region body
PF: predicated region fallthrough
CT: control target
= control target key end

     0   :  { %s662_s0 = inlined_call_operand.hbm [shape: f32[16,32], index: 0, kind: input, shape index: {}]   ;;  %s663_s1 = inlined_call_operand.hbm [shape: bf16[32,128], index: 1, kind: input, shape index: {}]   ;;  %s664_s2 = inlined_call_operand.vmem [shape: f32[1,128], index: 2, kind: input, shape index: {}]   ;;  %s665_s3 = inlined_call_operand.hbm [shape: bf16[128,128], index: 3, kind: input, shape index: {}]   ;;  %s666_s4 = inlined_call_operand.vmem [shape: f32[1,128], index: 4, kind: input, shape index: {}]   ;;  %s667_s5 = inlined_call_operand.vmem [shape: f32[1,128], index: 5, kind: input, shape index: {}]   ;;  %s668_s6 = inlined_call_operand.<no memory space> [shape: f32[1,1], index: 6, kind: input, shape index: {}]   ;;  %s669_s7 = inlined_call_operand.hbm [shape: f32[1,16], index: 7, kind: output, shape index: {}]  }
   0x1   :  { %v12_v0 = vstv %s668_s6 }
   0x2   :  { %13 = vst [vmem:[#allocation2] sm:$0x1] %v12_v0 }
   0x3   :  { %14 = vsyncpa [#allocation4], 0 }
   0x4   :  { %15 = vsyncpa [#allocation7], 0 }
   0x5   :  { %16 = vsyncpa [#allocation5], 0  ;;  %s541_s26 = smov [#allocation6]   ;;  %s447_s30 = scalar_lea.hbm %s663_s1, 256 }
   0x6   :  { %s34_s27 = sshll.u32 %s541_s26, 4  ;;  %p448_p0 = scmp.ne.s32.totalorder %s663_s1, %s447_s30  ;;  %s35_s27 = int_to_ptr.vmem [resolvable:$true] %s34_s27 }
   0x7   :  { %p451_p1 = scmp.lt.u32.totalorder %s447_s30, %s663_s1 }
   0x9   :  { %p453_p2 = pnand %p451_p1, %p448_p0 }
   0xb   :  { %456 = shalt.err (!%p453_p2)
}
   0xc   :  { %s457_s6 = scalar_lea.vmem %s35_s27, 256  ;;  %p462_p4 = scmp.lt.s32.totalorder %s35_s27, %s35_s27 }
   0xd   :  { %p458_p3 = scmp.ne.s32.totalorder %s35_s27, %s457_s6  ;;  %p463_p5 = scmp.lt.s32.totalorder %s457_s6, %s457_s6 }
   0xf   :  { %p464_p6 = por %p463_p5, %p462_p4 }
  0x11   :  { %p465_p7 = pnand %p464_p6, %p458_p3 }
  0x13   :  { %468 = shalt.err (!%p465_p7)
}
  0x14   :  { %s542_s12 = smov 64   ;;  %s543_s13 = smov 4  }
  0x15   :  { %40 = dma.hbm_to_vmem [thread:$0]  %s663_s1, 256, %s35_s27, [#allocation7], %s542_s12, %s542_s12, %s543_s13  }
  0x16   :  { %s544_s16 = smov [#allocation3]   ;;  %s469_s20 = scalar_lea.hbm %s662_s0, 256 }
  0x17   :  { %s22_s17 = sshll.u32 %s544_s16, 4  ;;  %p470_p8 = scmp.ne.s32.totalorder %s662_s0, %s469_s20  ;;  %s23_s17 = int_to_ptr.vmem [resolvable:$true] %s22_s17 }
  0x18   :  { %p473_p9 = scmp.lt.u32.totalorder %s469_s20, %s662_s0 }
  0x1a   :  { %p475_p10 = pnand %p473_p9, %p470_p8 }
  0x1c   :  { %478 = shalt.err (!%p475_p10)
}
  0x1d   :  { %s479_s25 = scalar_lea.vmem %s23_s17, 256  ;;  %p484_p12 = scmp.lt.s32.totalorder %s23_s17, %s23_s17 }
  0x1e   :  { %p480_p11 = scmp.ne.s32.totalorder %s23_s17, %s479_s25  ;;  %p485_p13 = scmp.lt.s32.totalorder %s479_s25, %s479_s25 }
  0x20   :  { %p486_p0 = por %p485_p13, %p484_p12 }
  0x22   :  { %p487_p1 = pnand %p486_p0, %p480_p11 }
  0x24   :  { %490 = shalt.err (!%p487_p1)
}
  0x25   :  { %s545_s1 = smov 128   ;;  %s546_s26 = smov 8  }
  0x26   :  { %28 = dma.hbm_to_vmem [thread:$0]  %s662_s0, 256, %s23_s17, [#allocation4], %s545_s1, %s545_s1, %s546_s26  }
  0x27   :  { %s547_s29 = smov [#allocation8]   ;;  %s491_s10 = scalar_lea.hbm %s665_s3, 1024 }
  0x28   :  { %s48_s30 = sshll.u32 %s547_s29, 4  ;;  %p492_p2 = scmp.ne.s32.totalorder %s665_s3, %s491_s10  ;;  %s49_s30 = int_to_ptr.vmem [resolvable:$true] %s48_s30 }
  0x29   :  { %p495_p3 = scmp.lt.u32.totalorder %s491_s10, %s665_s3 }
  0x2b   :  { %p497_p4 = pnand %p495_p3, %p492_p2 }
  0x2d   :  { %500 = shalt.err (!%p497_p4)
}
  0x2e   :  { %s501_s16 = scalar_lea.vmem %s49_s30, 1024  ;;  %p506_p6 = scmp.lt.s32.totalorder %s49_s30, %s49_s30 }
  0x2f   :  { %p502_p5 = scmp.ne.s32.totalorder %s49_s30, %s501_s16  ;;  %p507_p7 = scmp.lt.s32.totalorder %s501_s16, %s501_s16 }
  0x31   :  { %p508_p8 = por %p507_p7, %p506_p6 }
  0x33   :  { %p509_p9 = pnand %p508_p8, %p502_p5 }
  0x35   :  { %512 = shalt.err (!%p509_p9)
}
  0x36   :  { %54 = dma.hbm_to_vmem [thread:$0]  %s665_s3, 1024, %s49_s30, [#allocation7], %s542_s12, %s542_s12, %s543_s13  }
  0x37   :  { %535 = dma.done.wait [#allocation4], 256  }
  0x38   :  { %536 = vsyncadd [#allocation4], 4294967040 }
  0x39   :  { %537 = dma.done.wait [#allocation7], 1280  }
  0x3a   :  { %538 = vsyncadd [#allocation7], 4294966016  ;;  %v548_v1 = vmov 0.0   ;;  %vm549_vm0 = vmmov 0   ;;  %v437_v2 = vld [vmem:[#allocation6] sm:$0xff]   ;;  %v438_v3 = vld [vmem:[#allocation6 + $0x8] sm:$0xff]   ;;  %v266_v39 = vlaneseq }
  0x3b   :  { %386 = vmatprep.subr.bf16.mxu0 %v548_v1  ;;  %390 = vmatprep.mubr.msk.bf16.mxu0 %vm549_vm0, %v548_v1  ;;  %v71_v4 = vld [vmem:[#allocation3] sm:$0xff]  ;;  %v72_v5 = vld [vmem:[#allocation3 + $0x8] sm:$0xff]  ;;  %vm97_vm1 = vcmask 261120   ;;  %v441_v9 = vld [vmem:[#allocation8 + $0x10] sm:$0xff]   ;;  %v550_v25 = vmov 0.0|0.0   ;;  %v551_v27 = vmov 0  }
  0x3c   :  { %394 = vmatprep.subr.bf16.mxu1 %v548_v1  ;;  %410 = vmatprep.mubr.msk.bf16.mxu1 %vm549_vm0, %v548_v1  ;;  %v439_v6 = vld [vmem:[#allocation8] sm:$0xff]   ;;  %v73_v7 = vpack.c.bf16 %v72_v5, %v71_v4  ;;  %v440_v8 = vld [vmem:[#allocation8 + $0x8] sm:$0xff]   ;;  %v442_v10 = vld [vmem:[#allocation8 + $0x18] sm:$0xff]   ;;  %v267_v40 = vshrl.u32 %v266_v39, 7  ;;  %vm340_vm2 = vcmask 122880  }
  0x3d   :  { %387 = vmatpush3.bf16.msra.mxu0 %v437_v2  ;;  %395 = vmatpush3.bf16.msra.mxu1 %v439_v6  ;;  %v443_v11 = vld [vmem:[#allocation8 + $0x20] sm:$0xff]   ;;  %v444_v12 = vld [vmem:[#allocation8 + $0x28] sm:$0xff]   ;;  %v445_v13 = vld [vmem:[#allocation8 + $0x30] sm:$0xff]  }
  0x3e   :  { %388 = vmatprep.subr.bf16.mxu0 %v548_v1  ;;  %396 = vmatprep.subr.bf16.mxu1 %v548_v1  ;;  %v446_v14 = vld [vmem:[#allocation8 + $0x38] sm:$0xff]   ;;  %v268_v41 = vsub.s32 0, %v267_v40 }
  0x3f   :  { %v358_v15 = vld [vmem:[%s664_s2] ss:$0 sm:$0xff]  ;;  %436 = vset.pattern.permute.xlu0 %v551_v27 }
  0x40   :  { %v260_v26 = vld [vmem:[#allocation2] sm:$0x1] }
  0x41   :  { %389 = vmatpush3.bf16.msra.mxu0 %v438_v3  ;;  %397 = vmatpush3.bf16.msra.mxu1 %v440_v8  ;;  %v362_v28 = vld [vmem:[%s666_s4] ss:$0 sm:$0xff]  ;;  %s552_s4 = smov [#allocation9]  }
  0x42   :  { %398 = vmatprep.subr.bf16.mxu1 %v548_v1  ;;  %421 = vmatprep.subr.bf16.mxu0 %v550_v25  ;;  %v259_v38 = vld [vmem:[%s667_s5] sm:$0x1]  ;;  %s348_s20 = sshll.u32 %s552_s4, 4  ;;  %s349_s20 = int_to_ptr.vmem [resolvable:$true] %s348_s20 }
  0x43   :  { %263 = vperm.xlu0 %436, %v260_v26   ;;  %s513_s21 = scalar_lea.vmem %s349_s20, 16  ;;  %s517_s22 = scalar_lea.vmem %s349_s20, 32 }
  0x44   :  { %391 = vmatmul.mubr.msk.bf16.vlgmr.msra.gmra.mrb[0].mxu0 %vm97_vm1, %v73_v7  ;;  %p514_p10 = scmp.ne.s32.totalorder %s349_s20, %s513_s21  ;;  %p518_p11 = scmp.lt.s32.totalorder %s349_s20, %s349_s20 }
  0x45   :  { %418 = vmatprep.mubr.msk.f32.mxu0 %vm549_vm0, %v548_v1  ;;  %399 = vmatpush3.bf16.msra.mxu1 %v441_v9  ;;  %p519_p12 = scmp.lt.s32.totalorder %s517_s22, %s513_s21 }
  0x46   :  { %400 = vmatprep.subr.bf16.mxu1 %v548_v1 }
  0x47   :  { %p520_p13 = por %p519_p12, %p518_p11 }
  0x49   :  { %401 = vmatpush3.bf16.msra.mxu1 %v442_v10  ;;  %p521_p0 = pnand %p520_p13, %p514_p10 }
  0x4a   :  { %402 = vmatprep.subr.bf16.mxu1 %v548_v1 }
  0x4d   :  { %403 = vmatpush3.bf16.msra.mxu1 %v443_v11 }
  0x4e   :  { %404 = vmatprep.subr.bf16.mxu1 %v548_v1 }
  0x51   :  { %405 = vmatpush3.bf16.msra.mxu1 %v444_v12 }
  0x52   :  { %406 = vmatprep.subr.bf16.mxu1 %v548_v1 }
  0x55   :  { %407 = vmatpush3.bf16.msra.mxu1 %v445_v13 }
  0x56   :  { %408 = vmatprep.subr.bf16.mxu1 %v548_v1 }
  0x59   :  { %409 = vmatpush3.bf16.msra.mxu1 %v446_v14 }
  0xc2   :  { %v264_v42 = vpop.permute.xlu0 %263 }
  0xc3   :  { %v269_v43 = vrot.slane %v264_v42, %v268_v41 }
 0x117   :  { %v135_v16 = vpop.f32.mrb[0].mxu0 }
 0x118   :  { %v136_v17 = vadd.f32 %v358_v15, %v135_v16  ;;  %v392_v18 = vpop.f32.mrb[1].mxu0 }
 0x119   :  { %v138_v19 = vpop.f32.mrb[2].mxu0 }
 0x11a   :  { %v139_v20 = vadd.f32 %v358_v15, %v138_v19  ;;  %v393_v21 = vpop.f32.mrb[3].mxu0  ;;  %v142_v22 = vmax.f32 %v136_v17, 0.0 }
 0x11c   :  { %v143_v23 = vmax.f32 %v139_v20, 0.0 }
 0x11e   :  { %v144_v24 = vpack.c.bf16 %v143_v23, %v142_v22 }
 0x120   :  { %411 = vmatmul.mubr.bf16.vlgmr.msra.gmra.mrb[0].mxu1 %v144_v24 }
 0x1f3   :  { %v250_v29 = vpop.f32.mrb[0].mxu1 }
 0x1f4   :  { %v251_v30 = vadd.f32 %v362_v28, %v250_v29  ;;  %v412_v31 = vpop.f32.mrb[1].mxu1 }
 0x1f5   :  { %v253_v32 = vpop.f32.mrb[2].mxu1 }
 0x1f6   :  { %v254_v33 = vadd.f32 %v362_v28, %v253_v32  ;;  %v413_v34 = vpop.f32.mrb[3].mxu1  ;;  %v257_v35 = vmax.f32 %v251_v30, 0.0 }
 0x1f8   :  { %v258_v36 = vmax.f32 %v254_v33, 0.0 }
 0x1fa   :  { %v422_v37 = vpack.c.bf16 %v258_v36, %v257_v35 }
 0x1fc   :  { %423 = vmatpush3.bf16.xpose.msra.mxu0 %v422_v37 }
 0x203   :  { %419 = vmatmul.mubr.f32.vlgmr.msra.gmra.mrb[4].mxu0 %v259_v38 }
 0x2d6   :  { %v336_v44 = vpop.f32.mrb[4].mxu0 }
 0x2d7   :  { %v337_v45 = vadd.f32 %v336_v44, %v269_v43  ;;  %v420_v46 = vpop.f32.mrb[5].mxu0 }
 0x2d9   :  { %341 = vst.msk [vmem:[#allocation9] sm:$0x1] %vm340_vm2, %v337_v45 }
 0x2da   :  { %524 = shalt.err (!%p521_p0)
}
 0x2db   :  { %s525_s24 = scalar_lea.hbm %s669_s7, 16 }
 0x2dc   :  { %p526_p1 = scmp.ne.s32.totalorder %s669_s7, %s525_s24  ;;  %p529_p2 = scmp.lt.u32.totalorder %s525_s24, %s669_s7 }
 0x2de   :  { %p531_p3 = pnand %p529_p2, %p526_p1 }
 0x2e0   :  { %534 = shalt.err (!%p531_p3)
}
 0x2e1   :  { %351 = dma.vmem_to_hbm [thread:$0]  %s349_s20, 16, %s669_s7, [#allocation5]  }
 0x2e2   :  { %539 = dma.done.wait [#allocation5], 16  }
 0x2e3   :  { %540 = vsyncadd [#allocation5], 4294967280 }
 0x2e4   :  { %355 = vsyncpa [#allocation4], 1 }
 0x2e5   :  { %356 = vsyncpa [#allocation7], 1 }
 0x2e6   :  { %357 = vsyncpa [#allocation5], 1 }

</bundles_post_ra>
